<compile_context>
chip_gen: v7x
topology: tpu7x:2x2x1
jax: 0.10.0
libtpu: 0.0.40
codegen_flags: <defaults>
</compile_context>

<pallas_src>
import numpy as np
import jax
import jax.numpy as jnp
from jax.experimental import pallas as pl
from jax.experimental.pallas import tpu as pltpu


def make_pe_table(d_model: int, max_len: int = 500, dtype=jnp.float32) -> jnp.ndarray:
    """Positional-encoding buffer, identical to the torch module's __init__."""
    position = np.arange(0, max_len, dtype=np.float32)[:, None]            # (max_len, 1)
    div_term = np.exp(np.arange(0, d_model, 2, dtype=np.float32)
                      * (-np.log(10000.0) / d_model))                      # (ceil(D/2),)
    pe = np.zeros((max_len, d_model), dtype=np.float32)
    pe[:, 0::2] = np.sin(position * div_term)
    pe[:, 1::2] = np.cos(position * div_term[: d_model // 2])              # even & odd D
    return jnp.asarray(pe, dtype=dtype)                                    # (max_len, D)


def _pe_add_kernel(x_ref, pe_ref, o_ref):
    # x_ref / o_ref : (B, TC) lane-dense tile;  pe_ref : (1, TC) shared row.
    o_ref[...] = x_ref[...] + pe_ref[...]      # (1, TC) broadcasts over the B rows


def _choose_col_tile(total_cols: int, rows: int, itemsize: int,
                     target_bytes: int = 2 * 1024 * 1024) -> int:
    """Largest multiple of 128 that divides `total_cols` with a (rows, tile)
    block of roughly `target_bytes`; falls back to the full extent (always a
    legal block shape) when total_cols is not lane-aligned."""
    if total_cols % 128 != 0:
        # TODO(synk): for very large, non-128-aligned S*D, also tile the batch axis.
        return total_cols
    max_tile = max(128, target_bytes // max(1, rows * itemsize))
    best = 128
    for t in range(256, total_cols + 1, 128):
        if total_cols % t == 0 and t <= max_tile:
            best = t
    return min(best, total_cols)


def positional_encoding_forward(x: jnp.ndarray, pe: jnp.ndarray) -> jnp.ndarray:
    """x: (B, S, D); pe: (max_len, D).  Returns x + pe[:S][None, :, :]."""
    B, S, D = x.shape
    itemsize = jnp.dtype(x.dtype).itemsize

    # Host-side glue: static slice, dtype match, lane-dense flattening.
    pe_row = pe[:S, :].astype(x.dtype).reshape(1, S * D)    # (1, S*D)
    x2 = x.reshape(B, S * D)                                # (B, S*D)

    cols = S * D
    tc = _choose_col_tile(cols, B, itemsize)                # tc always divides cols
    grid = (cols // tc,)

    out2 = pl.pallas_call(
        _pe_add_kernel,
        out_shape=jax.ShapeDtypeStruct((B, cols), x.dtype),
        grid_spec=pltpu.PrefetchScalarGridSpec(
            num_scalar_prefetch=0,
            grid=grid,
            in_specs=[
                pl.BlockSpec((B, tc), lambda j: (0, j)),    # x column tile, all rows
                pl.BlockSpec((1, tc), lambda j: (0, j)),    # matching pe tile
            ],
            out_specs=pl.BlockSpec((B, tc), lambda j: (0, j)),
        ),
        compiler_params=pltpu.CompilerParams(
            dimension_semantics=("parallel",),
        ),
        input_output_aliases={0: 0},                        # add in place of x's view
        cost_estimate=pl.CostEstimate(
            flops=B * S * D,
            transcendentals=0,
            bytes_accessed=(2 * B * S * D + S * D) * itemsize,
        ),
    )(x2, pe_row)

    return out2.reshape(B, S, D)


if __name__ == "__main__":
    B, S, D = 2, 8, 32
    key = jax.random.PRNGKey(0)
    x = jax.random.normal(key, (B, S, D), dtype=jnp.float32)

    pe = make_pe_table(d_model=D, max_len=500, dtype=x.dtype)

    fwd = jax.jit(positional_encoding_forward)
    out = jax.block_until_ready(fwd(x, pe))

    # sanity check against plain-JAX reference
    ref = x + pe[:S, :][None, :, :]
    np.testing.assert_allclose(np.asarray(out), np.asarray(ref), rtol=1e-6, atol=1e-6)

    print("KERNEL_OK")
</pallas_src>

<mosaic_0001>
module attributes {stable_mosaic.version = 11 : i64} {
  func.func @_pe_add_kernel(%arg0: i32, %arg1: memref<2x256xf32, #tpu.memory_space<vmem>>, %arg2: memref<1x256xf32, #tpu.memory_space<vmem>>, %arg3: memref<2x256xf32, #tpu.memory_space<vmem>>) attributes {dimension_semantics = [#tpu.dimension_semantics<parallel>], iteration_bounds = array<i64: 1>, scalar_prefetch = 0 : i64, scratch_operands = 0 : i64, tpu.core_type = #tpu.core_type<tc>, window_params = [{transform_indices = @transform_0, window_bounds = array<i64: 2, 256>}, {transform_indices = @transform_1, window_bounds = array<i64: 1, 256>}, {transform_indices = @transform_2, window_bounds = array<i64: 2, 256>}]} {
    %c0 = arith.constant 0 : index
    %c0_0 = arith.constant 0 : index
    %0 = vector.load %arg1[%c0, %c0_0] : memref<2x256xf32, #tpu.memory_space<vmem>>, vector<2x256xf32>
    %c0_1 = arith.constant 0 : index
    %c0_2 = arith.constant 0 : index
    %1 = vector.load %arg2[%c0_1, %c0_2] : memref<1x256xf32, #tpu.memory_space<vmem>>, vector<1x256xf32>
    %2 = vector.broadcast %1 : vector<1x256xf32> to vector<2x256xf32>
    %3 = arith.addf %0, %2 : vector<2x256xf32>
    %c0_3 = arith.constant 0 : index
    %c0_4 = arith.constant 0 : index
    %4 = vector.load %arg3[%c0_3, %c0_4] : memref<2x256xf32, #tpu.memory_space<vmem>>, vector<2x256xf32>
    tpu.vector_store %arg3[%c0_3, %c0_4], %3 {strides = array<i32>} : memref<2x256xf32, #tpu.memory_space<vmem>>, vector<2x256xf32>,
    return
  }
  func.func @transform_0(%arg0: i32) -> (i32, i32) {
    %c0_i32 = arith.constant 0 : i32
    %c0_i32_0 = arith.constant 0 : i32
    return %c0_i32, %arg0 : i32, i32
  }
  func.func @transform_1(%arg0: i32) -> (i32, i32) {
    %c0_i32 = arith.constant 0 : i32
    %c0_i32_0 = arith.constant 0 : i32
    return %c0_i32, %arg0 : i32, i32
  }
  func.func @transform_2(%arg0: i32) -> (i32, i32) {
    %c0_i32 = arith.constant 0 : i32
    %c0_i32_0 = arith.constant 0 : i32
    return %c0_i32, %arg0 : i32, i32
  }
}

</mosaic_0001>

<bundles_post_ra>
// kernel: positional_encoding_forward.1
= control target key start
LH: loop header
LB: loop body
LE: loop exit
PB: predicated region body
PF: predicated region fallthrough
CT: control target
= control target key end

     0   :  { %v14_v0 = vlaneseq  ;;  %v38_v1 = vmov 1983009808   ;;  %s63_s1 = inlined_call_operand.vmem [shape: f32[1,256], index: 1, kind: input, shape index: {}]   ;;  %s64_s0 = inlined_call_operand.vmem [shape: f32[2,256], index: 0, kind: input, shape index: {}, may-alias: {0,2}]   ;;  %s65_s2 = inlined_call_operand.vmem [shape: f32[2,256], index: 2, kind: output, shape index: {}, may-alias: {0,2}]  }
   0x1   :  { %v24_v2 = vunpack.c.l.s4 %v38_v1  ;;  %v12_v4 = vld [vmem:[%s63_s1] sm:$0x3] }
   0x2   :  { %v15_v3 = vshrl.u32 %v14_v0, 7  ;;  %v11_v12 = vld [vmem:[%s64_s0] sm:$0xf] }
   0x3   :  { %v25_v5 = vunpack.c.0.s8 %v24_v2 }
   0x4   :  { %v16_v6 = vsub.s32 0, %v15_v3  ;;  %v20_v7 = vsub.s32 1, %v15_v3 }
   0x5   :  { %v28_v10 = vsub.s32 %v25_v5, %v15_v3 }
   0x6   :  { %v17_v8 = vrot.slane %v12_v4, %v16_v6  ;;  %v21_v9 = vrot.slane %v12_v4, %v20_v7 }
   0x8   :  { %v22_v11 = vcombine.low %v17_v8, %v21_v9 }
   0xa   :  { %v29_v13 = vrot.slane %v22_v11, %v28_v10 }
   0xc   :  { %v31_v14 = vadd.f32 %v29_v13, %v11_v12 }
   0xe   :  { %32 = vst [vmem:[%s65_s2] sm:$0xf] %v31_v14 }

</bundles_post_ra>
